<compile_context>
chip_gen: v7x
topology: tpu7x:2x2x1
jax: 0.10.0
libtpu: 0.0.40
codegen_flags: <defaults>
</compile_context>

<pallas_src>
import functools

import jax
import jax.numpy as jnp
from jax import lax
from jax.experimental import pallas as pl
from jax.experimental.pallas import tpu as pltpu


def _round_up(x: int, m: int) -> int:
    return (x + m - 1) // m * m


def _cast(v, dtype):
    if dtype is None or v.dtype == dtype:
        return v
    return v.astype(dtype)


def _linear_kernel_single_k(x_ref, w_ref, b_ref, o_ref, *, mxu_dtype):
    """Whole K fits in one block: dot + bias + store (no scratch, no pl.when)."""
    x = _cast(x_ref[...], mxu_dtype)
    w = _cast(w_ref[...], mxu_dtype)
    acc = jnp.dot(x, w, preferred_element_type=jnp.float32)
    o_ref[...] = (acc + b_ref[...].astype(jnp.float32)).astype(o_ref.dtype)


def _linear_kernel_multi_k(x_ref, w_ref, b_ref, o_ref, acc_ref, *,
                           tk, k_rem, mxu_dtype):
    """K split over the innermost grid axis; f32 accumulator in VMEM scratch."""
    k = pl.program_id(2)
    nk = pl.num_programs(2)

    @pl.when(k == 0)
    def _init():
        acc_ref[...] = jnp.zeros_like(acc_ref)

    x = x_ref[...]
    w = w_ref[...]
    if k_rem:  # static: D_in % tk != 0 -> last K block is ragged; zero the tail
        limit = jnp.where(k == nk - 1, k_rem, tk)
        x = jnp.where(lax.broadcasted_iota(jnp.int32, x.shape, 1) < limit, x, 0)
        w = jnp.where(lax.broadcasted_iota(jnp.int32, w.shape, 0) < limit, w, 0)

    acc_ref[...] += jnp.dot(_cast(x, mxu_dtype), _cast(w, mxu_dtype),
                            preferred_element_type=jnp.float32)

    @pl.when(k == nk - 1)
    def _finalize():
        # Single f32 epilogue (bias add) + one cast-and-store per output tile.
        o_ref[...] = (acc_ref[...] + b_ref[...].astype(jnp.float32)).astype(o_ref.dtype)


def net_forward(x, weight, bias, *, mxu_dtype=jnp.bfloat16):
    """x: (B, D_in); weight: (D_out, D_in) PyTorch layout; bias: (D_out,).

    mxu_dtype=jnp.bfloat16 (default) casts MXU operands to bf16 (native MXU
    rate, f32 accumulation); mxu_dtype=None keeps exact f32 Linear numerics.
    """
    B, D_in = x.shape
    D_out, D_in_w = weight.shape
    assert D_in_w == D_in and bias.shape == (D_out,)

    # One-time weight transpose -> (D_in, D_out): contraction dim lands on the
    # RHS sublanes (MXU-native), avoiding per-step in-kernel transposes.
    w_t = weight.T
    b2 = bias.reshape(1, D_out)

    # --- tile selection: blocks never exceed an array dim (no wrapper padding) -
    tm = B if B <= 512 else 512            # sublane dim of x / out
    tn = D_out if D_out <= 512 else 512    # lane dim of w_t / out
    tk = D_in if D_in <= 1024 else 1024    # contraction dim

    gi, gj, nk = pl.cdiv(B, tm), pl.cdiv(D_out, tn), pl.cdiv(D_in, tk)

    # v7x megacore: give both TensorCores work for non-trivial problems.
    flops = 2 * B * D_in * D_out
    if gi == 1 and gj == 1 and flops >= (1 << 26):
        if D_out >= 256:
            tn = _round_up(pl.cdiv(D_out, 2), 128)
            gj = pl.cdiv(D_out, tn)
        elif B >= 16:
            tm = _round_up(pl.cdiv(B, 2), 8)
            gi = pl.cdiv(B, tm)

    bytes_accessed = (B * D_in + D_in * D_out + D_out + B * D_out) * x.dtype.itemsize
    cost = pl.CostEstimate(flops=flops, transcendentals=0,
                           bytes_accessed=bytes_accessed)
    cparams = pltpu.CompilerParams(
        dimension_semantics=(("parallel", "parallel") if nk == 1
                             else ("parallel", "parallel", "arbitrary")),
        # Max double-buffered footprint at the tile caps is ~11 MiB; 32 MiB gives
        # headroom everywhere (v5e's scoped default is only 16 MiB, v7x physical
        # is 64 MiB so this stays safe there too).
        vmem_limit_bytes=32 * 1024 * 1024,
    )

    if nk == 1:
        # Common case (any D_in <= 1024, incl. the shipped Net): no k-loop, no
        # accumulator scratch, no pl.when.
        kernel = functools.partial(_linear_kernel_single_k, mxu_dtype=mxu_dtype)
        grid = (gi, gj)
        in_specs = [
            pl.BlockSpec((tm, tk), lambda i, j: (i, 0)),   # x tile
            pl.BlockSpec((tk, tn), lambda i, j: (0, j)),   # W^T tile (K on sublanes)
            pl.BlockSpec((1, tn), lambda i, j: (0, j)),    # bias tile
        ]
        out_specs = pl.BlockSpec((tm, tn), lambda i, j: (i, j))
        scratch_shapes = ()
    else:
        kernel = functools.partial(_linear_kernel_multi_k, tk=tk,
                                   k_rem=D_in % tk, mxu_dtype=mxu_dtype)
        grid = (gi, gj, nk)
        in_specs = [
            pl.BlockSpec((tm, tk), lambda i, j, k: (i, k)),   # x tile
            pl.BlockSpec((tk, tn), lambda i, j, k: (k, j)),   # W^T tile
            pl.BlockSpec((1, tn), lambda i, j, k: (0, j)),    # bias, constant over k
        ]
        out_specs = pl.BlockSpec((tm, tn), lambda i, j, k: (i, j))
        scratch_shapes = (pltpu.VMEM((tm, tn), jnp.float32),)

    return pl.pallas_call(
        kernel,
        out_shape=jax.ShapeDtypeStruct((B, D_out), x.dtype),
        grid=grid,
        in_specs=in_specs,
        out_specs=out_specs,
        scratch_shapes=scratch_shapes,
        compiler_params=cparams,
        cost_estimate=cost,
    )(x, w_t, b2)


if __name__ == "__main__":
    # Shapes consistent with Net(input_size=32, num_classes=16) at batch 8.
    batch, input_size, num_classes = 8, 32, 16

    key = jax.random.PRNGKey(0)
    kx, kw, kb = jax.random.split(key, 3)

    # Mimics PyTorch Linear's uniform(-k, k), k = 1/sqrt(in_features).
    bound = 1.0 / jnp.sqrt(jnp.float32(input_size))
    weight = jax.random.uniform(kw, (num_classes, input_size), jnp.float32, -bound, bound)
    bias = jax.random.uniform(kb, (num_classes,), jnp.float32, -bound, bound)
    x = jax.random.normal(kx, (batch, input_size), jnp.float32)

    ref = jnp.dot(x, weight.T, precision=lax.Precision.HIGHEST) + bias

    # Default bf16-MXU path (native MXU rate on all generations).
    out = jax.block_until_ready(net_forward(x, weight, bias))
    assert out.shape == (batch, num_classes)
    assert jnp.allclose(out, ref, atol=2e-2, rtol=2e-2)

    # Exact f32 path (preserves PyTorch Linear numerics).
    out_f32 = jax.block_until_ready(net_forward(x, weight, bias, mxu_dtype=None))
    assert jnp.allclose(out_f32, ref, atol=1e-5, rtol=1e-5)

    # Secondary check: exercises the multi-K path (D_in > 1024), the in-kernel
    # K-tail masking (1100 % 1024 != 0), and ragged N / bias / output blocks —
    # all without any wrapper-side padding of the inputs.
    b2_, k2_, n2_ = 64, 1100, 40
    kx2, kw2, kb2 = jax.random.split(jax.random.PRNGKey(1), 3)
    bound2 = 1.0 / jnp.sqrt(jnp.float32(k2_))
    w2 = jax.random.uniform(kw2, (n2_, k2_), jnp.float32, -bound2, bound2)
    bb2 = jax.random.uniform(kb2, (n2_,), jnp.float32, -bound2, bound2)
    x2 = jax.random.normal(kx2, (b2_, k2_), jnp.float32)
    ref2 = jnp.dot(x2, w2.T, precision=lax.Precision.HIGHEST) + bb2

    out2_f32 = jax.block_until_ready(net_forward(x2, w2, bb2, mxu_dtype=None))
    assert out2_f32.shape == (b2_, n2_)
    assert jnp.allclose(out2_f32, ref2, atol=5e-3, rtol=5e-3)

    out2_bf16 = jax.block_until_ready(net_forward(x2, w2, bb2))
    assert jnp.allclose(out2_bf16, ref2, atol=5e-2, rtol=5e-2)

    print("KERNEL_OK")
</pallas_src>

<mosaic_0001>
module attributes {stable_mosaic.version = 11 : i64} {
  func.func @_linear_kernel_single_k(%arg0: i32, %arg1: i32, %arg2: memref<8x32xf32, #tpu.memory_space<vmem>>, %arg3: memref<32x16xf32, #tpu.memory_space<vmem>>, %arg4: memref<1x16xf32, #tpu.memory_space<vmem>>, %arg5: memref<8x16xf32, #tpu.memory_space<vmem>>) attributes {dimension_semantics = [#tpu.dimension_semantics<parallel>, #tpu.dimension_semantics<parallel>], iteration_bounds = array<i64: 1, 1>, scalar_prefetch = 0 : i64, scratch_operands = 0 : i64, tpu.core_type = #tpu.core_type<tc>, window_params = [{transform_indices = @transform_0, window_bounds = array<i64: 8, 32>}, {transform_indices = @transform_1, window_bounds = array<i64: 32, 16>}, {transform_indices = @transform_2, window_bounds = array<i64: 1, 16>}, {transform_indices = @transform_3, window_bounds = array<i64: 8, 16>}]} {
    %c0 = arith.constant 0 : index
    %c0_0 = arith.constant 0 : index
    %0 = vector.load %arg2[%c0, %c0_0] : memref<8x32xf32, #tpu.memory_space<vmem>>, vector<8x32xf32>
    %1 = arith.truncf %0 : vector<8x32xf32> to vector<8x32xbf16>
    %c0_1 = arith.constant 0 : index
    %c0_2 = arith.constant 0 : index
    %2 = vector.load %arg3[%c0_1, %c0_2] : memref<32x16xf32, #tpu.memory_space<vmem>>, vector<32x16xf32>
    %3 = arith.truncf %2 : vector<32x16xf32> to vector<32x16xbf16>
    %cst = arith.constant dense<0.000000e+00> : vector<8x16xf32>
    %4 = tpu.matmul %1, %3, %cst {dimension_numbers = #tpu.dot_dimension_numbers<[1], [0], [0], [1], [0, 0, 1, 1], [], []>} : vector<8x32xbf16>, vector<32x16xbf16>, vector<8x16xf32> -> vector<8x16xf32>
    %c0_3 = arith.constant 0 : index
    %c0_4 = arith.constant 0 : index
    %5 = vector.load %arg4[%c0_3, %c0_4] : memref<1x16xf32, #tpu.memory_space<vmem>>, vector<1x16xf32>
    %6 = vector.broadcast %5 : vector<1x16xf32> to vector<8x16xf32>
    %7 = arith.addf %4, %6 : vector<8x16xf32>
    %c0_5 = arith.constant 0 : index
    %c0_6 = arith.constant 0 : index
    %8 = vector.load %arg5[%c0_5, %c0_6] : memref<8x16xf32, #tpu.memory_space<vmem>>, vector<8x16xf32>
    tpu.vector_store %arg5[%c0_5, %c0_6], %7 {strides = array<i32>} : memref<8x16xf32, #tpu.memory_space<vmem>>, vector<8x16xf32>,
    return
  }
  func.func @transform_0(%arg0: i32, %arg1: i32) -> (i32, i32) {
    %c0_i32 = arith.constant 0 : i32
    %c0_i32_0 = arith.constant 0 : i32
    return %arg0, %c0_i32 : i32, i32
  }
  func.func @transform_1(%arg0: i32, %arg1: i32) -> (i32, i32) {
    %c0_i32 = arith.constant 0 : i32
    %c0_i32_0 = arith.constant 0 : i32
    return %c0_i32, %arg1 : i32, i32
  }
  func.func @transform_2(%arg0: i32, %arg1: i32) -> (i32, i32) {
    %c0_i32 = arith.constant 0 : i32
    %c0_i32_0 = arith.constant 0 : i32
    return %c0_i32, %arg1 : i32, i32
  }
  func.func @transform_3(%arg0: i32, %arg1: i32) -> (i32, i32) {
    %c0_i32 = arith.constant 0 : i32
    return %arg0, %arg1 : i32, i32
  }
}

</mosaic_0001>

<bundles_post_ra>
// kernel: tpu_custom_call.1
= control target key start
LH: loop header
LB: loop body
LE: loop exit
PB: predicated region body
PF: predicated region fallthrough
CT: control target
= control target key end

     0   :  { %v131_v3 = vmov 0.0   ;;  %vm132_vm0 = vmmov 0   ;;  %s184_s0 = inlined_call_operand.vmem [shape: f32[8,32], index: 0, kind: input, shape index: {}]   ;;  %s185_s1 = inlined_call_operand.vmem [shape: f32[32,16], index: 1, kind: input, shape index: {}]   ;;  %s186_s2 = inlined_call_operand.vmem [shape: f32[1,16], index: 2, kind: input, shape index: {}]   ;;  %s187_s3 = inlined_call_operand.hbm [shape: f32[8,16], index: 3, kind: output, shape index: {}]  }
   0x1   :  { %v18_v0 = vld [vmem:[%s185_s1] sm:$0xff]  ;;  %v19_v1 = vld [vmem:[%s185_s1 + $0x8] sm:$0xff]  ;;  %v20_v2 = vld [vmem:[%s185_s1 + $0x10] sm:$0xff]  ;;  %96 = vmatprep.subr.bf16.mxu0 %v131_v3  ;;  %100 = vmatprep.mubr.msk.bf16.mxu0 %vm132_vm0, %v131_v3 }
   0x2   :  { %v22_v4 = vpack.c.bf16 %v19_v1, %v18_v0  ;;  %v21_v5 = vld [vmem:[%s185_s1 + $0x18] sm:$0xff] }
   0x3   :  { %8 = vsyncpa [#allocation3], 0  ;;  %v23_v6 = vpack.c.bf16 %v21_v5, %v20_v2  ;;  %v16_v7 = vld [vmem:[%s184_s0] sm:$0xff]  ;;  %vm31_vm1 = vcmask 261120   ;;  %s133_s24 = smov [#allocation2]   ;;  %vm75_vm2 = vcmask 130048  }
   0x4   :  { %97 = vmatpush3.bf16.msra.mxu0 %v22_v4  ;;  %v17_v8 = vpack.c.bf16 %v16_v7, %v16_v7  ;;  %v91_v9 = vld [vmem:[%s186_s2] ss:$0 sm:$0xff]  ;;  %s83_s1 = sshll.u32 %s133_s24, 4  ;;  %s84_s1 = int_to_ptr.vmem [resolvable:$true] %s83_s1 }
   0x5   :  { %98 = vmatprep.subr.bf16.mxu0 %v131_v3  ;;  %s107_s0 = scalar_lea.vmem %s84_s1, 128  ;;  %p112_p1 = scmp.lt.s32.totalorder %s84_s1, %s84_s1 }
   0x6   :  { %p108_p0 = scmp.ne.s32.totalorder %s84_s1, %s107_s0  ;;  %p113_p2 = scmp.lt.s32.totalorder %s107_s0, %s107_s0 }
   0x8   :  { %99 = vmatpush3.bf16.msra.mxu0 %v23_v6  ;;  %p114_p3 = por %p113_p2, %p112_p1 }
   0xa   :  { %p115_p4 = pnand %p114_p3, %p108_p0 }
   0xb   :  { %101 = vmatmul.mubr.msk.bf16.vlgmr.msra.gmra.mrb[0].mxu0 %vm31_vm1, %v17_v8 }
  0xde   :  { %v69_v10 = vpop.f32.mrb[0].mxu0 }
  0xdf   :  { %v70_v11 = vadd.f32 %v91_v9, %v69_v10  ;;  %v102_v12 = vpop.f32.mrb[1].mxu0 }
  0xe0   :  { %v72_v13 = vpop.f32.mrb[2].mxu0 }
  0xe1   :  { %v103_v14 = vpop.f32.mrb[3].mxu0  ;;  %76 = vst.msk [vmem:[#allocation2] sm:$0xff] %vm75_vm2, %v70_v11 }
  0xe2   :  { %118 = shalt.err (!%p115_p4)
}
  0xe3   :  { %s119_s2 = scalar_lea.hbm %s187_s3, 128 }
  0xe4   :  { %p120_p5 = scmp.ne.s32.totalorder %s187_s3, %s119_s2  ;;  %p123_p6 = scmp.lt.u32.totalorder %s119_s2, %s187_s3 }
  0xe6   :  { %p125_p7 = pnand %p123_p6, %p120_p5 }
  0xe8   :  { %128 = shalt.err (!%p125_p7)
}
  0xe9   :  { %86 = dma.vmem_to_hbm [thread:$0]  %s84_s1, 128, %s187_s3, [#allocation3]  }
  0xea   :  { %129 = dma.done.wait [#allocation3], 128  }
  0xeb   :  { %130 = vsyncadd [#allocation3], 4294967168 }
  0xec   :  { %90 = vsyncpa [#allocation3], 1 }

</bundles_post_ra>
